<compile_context>
chip_gen: v5e
topology: v5e:2x2
jax: 0.10.0
libtpu: 0.0.40
codegen_flags: <defaults>
</compile_context>

<pallas_src>
import jax
import jax.numpy as jnp
from jax.experimental import pallas as pl
from jax.experimental.pallas import tpu as pltpu

_LANE = 128
_MAX_TILE_B = 512  # rows per grid step


def _round_up(n, m):
    return ((n + m - 1) // m) * m


def _actor_high_kernel(x_ref, w1_ref, b1_ref, w2_ref, b2_ref, w3_ref, b3_ref,
                       o_ref):
    """Fused 3-layer MLP, ReLU after every layer (matches nn.Sequential)."""
    x = x_ref[...]

    h = jnp.dot(x, w1_ref[...], preferred_element_type=jnp.float32)
    h = jnp.maximum(h + b1_ref[...], 0.0)

    h = jnp.dot(h, w2_ref[...], preferred_element_type=jnp.float32)
    h = jnp.maximum(h + b2_ref[...], 0.0)

    h = jnp.dot(h, w3_ref[...], preferred_element_type=jnp.float32)
    o_ref[...] = jnp.maximum(h + b3_ref[...], 0.0).astype(o_ref.dtype)


def pad_params(params):
    """One-time zero-padding of weights so hidden/output dims are 128-lane
    dense.  Returns (padded_params, true goal_dim)."""
    w1, b1, w2, b2, w3, b3 = params
    s_in, h = w1.shape
    a = w3.shape[1]
    hp = _round_up(h, _LANE)
    ap = _round_up(a, _LANE)

    w1p = jnp.zeros((s_in, hp), w1.dtype).at[:, :h].set(w1)
    b1p = jnp.zeros((1, hp), b1.dtype).at[:, :h].set(b1)
    w2p = jnp.zeros((hp, hp), w2.dtype).at[:h, :h].set(w2)
    b2p = jnp.zeros((1, hp), b2.dtype).at[:, :h].set(b2)
    w3p = jnp.zeros((hp, ap), w3.dtype).at[:h, :a].set(w3)
    b3p = jnp.zeros((1, ap), b3.dtype).at[:, :a].set(b3)
    return (w1p, b1p, w2p, b2p, w3p, b3p), a


def actor_high_forward(state, padded_params, goal_dim):
    """state: (B, state_dim) f32.  Returns (B, goal_dim) f32."""
    w1, b1, w2, b2, w3, b3 = padded_params
    B, S = state.shape
    assert w1.shape[0] == S
    Ap = w3.shape[1]

    # Batch tiling: pad rows to sublane granularity; row tile <= _MAX_TILE_B so
    # large batches get a multi-step grid that v7x shards across its 2 TCs.
    if B <= _MAX_TILE_B:
        tile_b = _round_up(B, 8)
        Bp = tile_b
    else:
        tile_b = _MAX_TILE_B
        Bp = _round_up(B, tile_b)
    if Bp != B:
        state = jnp.pad(state, ((0, Bp - B), (0, 0)))

    grid = (Bp // tile_b,)

    # state block: last dim == full array dim (exempt from the 128-lane rule).
    # Weight/bias blocks are grid-invariant, so they are DMA'd once and stay
    # resident in VMEM across all batch tiles.
    in_specs = [
        pl.BlockSpec((tile_b, S), lambda i: (i, 0)),
        pl.BlockSpec(w1.shape, lambda i: (0, 0)),
        pl.BlockSpec(b1.shape, lambda i: (0, 0)),
        pl.BlockSpec(w2.shape, lambda i: (0, 0)),
        pl.BlockSpec(b2.shape, lambda i: (0, 0)),
        pl.BlockSpec(w3.shape, lambda i: (0, 0)),
        pl.BlockSpec(b3.shape, lambda i: (0, 0)),
    ]
    out_spec = pl.BlockSpec((tile_b, Ap), lambda i: (i, 0))

    out = pl.pallas_call(
        _actor_high_kernel,
        out_shape=jax.ShapeDtypeStruct((Bp, Ap), jnp.float32),
        grid=grid,
        in_specs=in_specs,
        out_specs=out_spec,
        compiler_params=pltpu.CompilerParams(
            dimension_semantics=("parallel",)),
    )(state, w1, b1, w2, b2, w3, b3)

    return out[:B, :goal_dim]


def init_params(key, state_dim, goal_dim, hidden=64):
    """PyTorch-Linear-like uniform fan-in init; weights stored (in, out)."""
    ks = jax.random.split(key, 6)

    def lin(kw, kb, fan_in, fan_out):
        bound = 1.0 / jnp.sqrt(fan_in)
        w = jax.random.uniform(kw, (fan_in, fan_out), jnp.float32, -bound, bound)
        b = jax.random.uniform(kb, (1, fan_out), jnp.float32, -bound, bound)
        return w, b

    w1, b1 = lin(ks[0], ks[1], state_dim, hidden)
    w2, b2 = lin(ks[2], ks[3], hidden, hidden)
    w3, b3 = lin(ks[4], ks[5], hidden, goal_dim)
    return (w1, b1, w2, b2, w3, b3)


def _reference(state, params):
    w1, b1, w2, b2, w3, b3 = params
    h = jnp.maximum(state @ w1 + b1, 0.0)
    h = jnp.maximum(h @ w2 + b2, 0.0)
    return jnp.maximum(h @ w3 + b3, 0.0)


if __name__ == "__main__":
    key = jax.random.PRNGKey(0)
    k_state, k_params, k_state2, k_state3 = jax.random.split(key, 4)

    # Small bioreactor-ish dims.
    batch, state_dim, goal_dim = 8, 6, 2

    state = jax.random.normal(k_state, (batch, state_dim), jnp.float32)
    params = init_params(k_params, state_dim, goal_dim)
    padded_params, _ = pad_params(params)

    out = jax.block_until_ready(
        actor_high_forward(state, padded_params, goal_dim))
    ref = _reference(state, params)
    assert out.shape == (batch, goal_dim)
    assert jnp.allclose(out, ref, atol=1e-5, rtol=1e-5)

    # Non-multiple-of-sublane batch, single grid step.
    batch2 = 300
    state2 = jax.random.normal(k_state2, (batch2, state_dim), jnp.float32)
    out2 = jax.block_until_ready(
        actor_high_forward(state2, padded_params, goal_dim))
    ref2 = _reference(state2, params)
    assert out2.shape == (batch2, goal_dim)
    assert jnp.allclose(out2, ref2, atol=1e-5, rtol=1e-5)

    # Large batch: exercises row padding plus a multi-step "parallel" grid.
    batch3 = 1300
    state3 = jax.random.normal(k_state3, (batch3, state_dim), jnp.float32)
    out3 = jax.block_until_ready(
        actor_high_forward(state3, padded_params, goal_dim))
    ref3 = _reference(state3, params)
    assert out3.shape == (batch3, goal_dim)
    assert jnp.allclose(out3, ref3, atol=1e-5, rtol=1e-5)

    print("KERNEL_OK")
</pallas_src>

<mosaic_0001>
module attributes {stable_mosaic.version = 11 : i64} {
  func.func @_actor_high_kernel(%arg0: i32, %arg1: memref<8x6xf32, #tpu.memory_space<vmem>>, %arg2: memref<6x128xf32, #tpu.memory_space<vmem>>, %arg3: memref<1x128xf32, #tpu.memory_space<vmem>>, %arg4: memref<128x128xf32, #tpu.memory_space<vmem>>, %arg5: memref<1x128xf32, #tpu.memory_space<vmem>>, %arg6: memref<128x128xf32, #tpu.memory_space<vmem>>, %arg7: memref<1x128xf32, #tpu.memory_space<vmem>>, %arg8: memref<8x128xf32, #tpu.memory_space<vmem>>) attributes {dimension_semantics = [#tpu.dimension_semantics<parallel>], iteration_bounds = array<i64: 1>, scalar_prefetch = 0 : i64, scratch_operands = 0 : i64, tpu.core_type = #tpu.core_type<tc>, window_params = [{transform_indices = @transform_0, window_bounds = array<i64: 8, 6>}, {pipeline_mode = #tpu.pipeline_mode<synchronous>, transform_indices = @transform_1, window_bounds = array<i64: 6, 128>}, {pipeline_mode = #tpu.pipeline_mode<synchronous>, transform_indices = @transform_2, window_bounds = array<i64: 1, 128>}, {pipeline_mode = #tpu.pipeline_mode<synchronous>, transform_indices = @transform_3, window_bounds = array<i64: 128, 128>}, {pipeline_mode = #tpu.pipeline_mode<synchronous>, transform_indices = @transform_4, window_bounds = array<i64: 1, 128>}, {pipeline_mode = #tpu.pipeline_mode<synchronous>, transform_indices = @transform_5, window_bounds = array<i64: 128, 128>}, {pipeline_mode = #tpu.pipeline_mode<synchronous>, transform_indices = @transform_6, window_bounds = array<i64: 1, 128>}, {transform_indices = @transform_7, window_bounds = array<i64: 8, 128>}]} {
    %c0 = arith.constant 0 : index
    %c0_0 = arith.constant 0 : index
    %0 = vector.load %arg1[%c0, %c0_0] : memref<8x6xf32, #tpu.memory_space<vmem>>, vector<8x6xf32>
    %c0_1 = arith.constant 0 : index
    %c0_2 = arith.constant 0 : index
    %1 = vector.load %arg2[%c0_1, %c0_2] : memref<6x128xf32, #tpu.memory_space<vmem>>, vector<6x128xf32>
    %cst = arith.constant dense<0.000000e+00> : vector<8x128xf32>
    %2 = tpu.matmul %0, %1, %cst {dimension_numbers = #tpu.dot_dimension_numbers<[1], [0], [0], [1], [0, 0, 1, 1], [], []>} : vector<8x6xf32>, vector<6x128xf32>, vector<8x128xf32> -> vector<8x128xf32>
    %c0_3 = arith.constant 0 : index
    %c0_4 = arith.constant 0 : index
    %3 = vector.load %arg3[%c0_3, %c0_4] : memref<1x128xf32, #tpu.memory_space<vmem>>, vector<1x128xf32>
    %4 = vector.broadcast %3 : vector<1x128xf32> to vector<8x128xf32>
    %5 = arith.addf %2, %4 : vector<8x128xf32>
    %cst_5 = arith.constant 0.000000e+00 : f32
    %6 = vector.broadcast %cst_5 : f32 to vector<8x128xf32>
    %7 = arith.maximumf %5, %6 : vector<8x128xf32>
    %c0_6 = arith.constant 0 : index
    %c0_7 = arith.constant 0 : index
    %8 = vector.load %arg4[%c0_6, %c0_7] : memref<128x128xf32, #tpu.memory_space<vmem>>, vector<128x128xf32>
    %cst_8 = arith.constant dense<0.000000e+00> : vector<8x128xf32>
    %9 = tpu.matmul %7, %8, %cst_8 {dimension_numbers = #tpu.dot_dimension_numbers<[1], [0], [0], [1], [0, 0, 1, 1], [], []>} : vector<8x128xf32>, vector<128x128xf32>, vector<8x128xf32> -> vector<8x128xf32>
    %c0_9 = arith.constant 0 : index
    %c0_10 = arith.constant 0 : index
    %10 = vector.load %arg5[%c0_9, %c0_10] : memref<1x128xf32, #tpu.memory_space<vmem>>, vector<1x128xf32>
    %11 = vector.broadcast %10 : vector<1x128xf32> to vector<8x128xf32>
    %12 = arith.addf %9, %11 : vector<8x128xf32>
    %cst_11 = arith.constant 0.000000e+00 : f32
    %13 = vector.broadcast %cst_11 : f32 to vector<8x128xf32>
    %14 = arith.maximumf %12, %13 : vector<8x128xf32>
    %c0_12 = arith.constant 0 : index
    %c0_13 = arith.constant 0 : index
    %15 = vector.load %arg6[%c0_12, %c0_13] : memref<128x128xf32, #tpu.memory_space<vmem>>, vector<128x128xf32>
    %cst_14 = arith.constant dense<0.000000e+00> : vector<8x128xf32>
    %16 = tpu.matmul %14, %15, %cst_14 {dimension_numbers = #tpu.dot_dimension_numbers<[1], [0], [0], [1], [0, 0, 1, 1], [], []>} : vector<8x128xf32>, vector<128x128xf32>, vector<8x128xf32> -> vector<8x128xf32>
    %c0_15 = arith.constant 0 : index
    %c0_16 = arith.constant 0 : index
    %17 = vector.load %arg7[%c0_15, %c0_16] : memref<1x128xf32, #tpu.memory_space<vmem>>, vector<1x128xf32>
    %18 = vector.broadcast %17 : vector<1x128xf32> to vector<8x128xf32>
    %19 = arith.addf %16, %18 : vector<8x128xf32>
    %cst_17 = arith.constant 0.000000e+00 : f32
    %20 = vector.broadcast %cst_17 : f32 to vector<8x128xf32>
    %21 = arith.maximumf %19, %20 : vector<8x128xf32>
    %c0_18 = arith.constant 0 : index
    %c0_19 = arith.constant 0 : index
    %22 = vector.load %arg8[%c0_18, %c0_19] : memref<8x128xf32, #tpu.memory_space<vmem>>, vector<8x128xf32>
    tpu.vector_store %arg8[%c0_18, %c0_19], %21 {strides = array<i32>} : memref<8x128xf32, #tpu.memory_space<vmem>>, vector<8x128xf32>,
    return
  }
  func.func @transform_0(%arg0: i32) -> (i32, i32) {
    %c0_i32 = arith.constant 0 : i32
    %c0_i32_0 = arith.constant 0 : i32
    return %arg0, %c0_i32 : i32, i32
  }
  func.func @transform_1(%arg0: i32) -> (i32, i32) {
    %c0_i32 = arith.constant 0 : i32
    %c0_i32_0 = arith.constant 0 : i32
    %c0_i32_1 = arith.constant 0 : i32
    return %c0_i32, %c0_i32_0 : i32, i32
  }
  func.func @transform_2(%arg0: i32) -> (i32, i32) {
    %c0_i32 = arith.constant 0 : i32
    %c0_i32_0 = arith.constant 0 : i32
    %c0_i32_1 = arith.constant 0 : i32
    return %c0_i32, %c0_i32_0 : i32, i32
  }
  func.func @transform_3(%arg0: i32) -> (i32, i32) {
    %c0_i32 = arith.constant 0 : i32
    %c0_i32_0 = arith.constant 0 : i32
    %c0_i32_1 = arith.constant 0 : i32
    return %c0_i32, %c0_i32_0 : i32, i32
  }
  func.func @transform_4(%arg0: i32) -> (i32, i32) {
    %c0_i32 = arith.constant 0 : i32
    %c0_i32_0 = arith.constant 0 : i32
    %c0_i32_1 = arith.constant 0 : i32
    return %c0_i32, %c0_i32_0 : i32, i32
  }
  func.func @transform_5(%arg0: i32) -> (i32, i32) {
    %c0_i32 = arith.constant 0 : i32
    %c0_i32_0 = arith.constant 0 : i32
    %c0_i32_1 = arith.constant 0 : i32
    return %c0_i32, %c0_i32_0 : i32, i32
  }
  func.func @transform_6(%arg0: i32) -> (i32, i32) {
    %c0_i32 = arith.constant 0 : i32
    %c0_i32_0 = arith.constant 0 : i32
    %c0_i32_1 = arith.constant 0 : i32
    return %c0_i32, %c0_i32_0 : i32, i32
  }
  func.func @transform_7(%arg0: i32) -> (i32, i32) {
    %c0_i32 = arith.constant 0 : i32
    %c0_i32_0 = arith.constant 0 : i32
    return %arg0, %c0_i32 : i32, i32
  }
}

</mosaic_0001>

<bundles_post_ra>
// kernel: tpu_custom_call.1
= control target key start
LH: loop header
LB: loop body
LE: loop exit
PB: predicated region body
PF: predicated region fallthrough
CT: control target
= control target key end

     0   :  { %12 = vsyncpa [#allocation3], 0  ;;  %s434_s0 = inlined_call_operand.hbm [shape: f32[8,6], index: 0, kind: input, shape index: {}]   ;;  %s435_s1 = inlined_call_operand.hbm [shape: f32[6,128], index: 1, kind: input, shape index: {}]   ;;  %s436_s2 = inlined_call_operand.vmem [shape: f32[1,128], index: 2, kind: input, shape index: {}]   ;;  %s437_s3 = inlined_call_operand.hbm [shape: f32[128,128], index: 3, kind: input, shape index: {}]   ;;  %s438_s4 = inlined_call_operand.vmem [shape: f32[1,128], index: 4, kind: input, shape index: {}]   ;;  %s439_s5 = inlined_call_operand.hbm [shape: f32[128,128], index: 5, kind: input, shape index: {}]   ;;  %s440_s6 = inlined_call_operand.vmem [shape: f32[1,128], index: 6, kind: input, shape index: {}]   ;;  %s441_s7 = inlined_call_operand.hbm [shape: f32[8,128], index: 7, kind: output, shape index: {}]  }
   0x1   :  { %13 = vsyncpa [#allocation6], 0 }
   0x2   :  { %14 = vsyncpa [#allocation9], 0  ;;  %s32_s26 = sshll.u32 %s435_s1, 4  ;;  %s33_s26 = int_to_ptr.hbm [resolvable:$true] %s32_s26 }
   0x3   :  { %15 = vsyncpa [#allocation4], 0  ;;  %s363_s27 = smov [#allocation5]   ;;  %s21_s8 = sshll.u32 %s434_s0, 4  ;;  %s22_s8 = int_to_ptr.hbm [resolvable:$true] %s21_s8 }
   0x4   :  { %s34_s28 = sshll.u32 %s363_s27, 4  ;;  %s364_s9 = smov [#allocation2]   ;;  %s35_s28 = int_to_ptr.vmem [resolvable:$true] %s34_s28 }
   0x5   :  { %37 = dma.hbm_to_vmem [thread:$0]  %s33_s26, 128, %s35_s28, [#allocation6]  }
   0x6   :  { %s23_s10 = sshll.u32 %s364_s9, 4  ;;  %s44_s13 = sshll.u32 %s437_s3, 4  ;;  %s24_s10 = int_to_ptr.vmem [resolvable:$true] %s23_s10  ;;  %s45_s13 = int_to_ptr.hbm [resolvable:$true] %s44_s13 }
   0x7   :  { %26 = dma.hbm_to_vmem [thread:$0]  %s22_s8, 128, %s24_s10, [#allocation3]  }
   0x8   :  { %s365_s1 = smov [#allocation7]   ;;  %s59_s17 = sshll.u32 %s439_s5, 4  ;;  %s60_s17 = int_to_ptr.hbm [resolvable:$true] %s59_s17 }
   0x9   :  { %s46_s14 = sshll.u32 %s365_s1, 4  ;;  %s366_s18 = smov 128   ;;  %s47_s14 = int_to_ptr.vmem [resolvable:$true] %s46_s14 }
   0xa   :  { %s367_s0 = smov 8   ;;  %s368_s19 = smov [#allocation8]  }
   0xb   :  { %52 = dma.hbm_to_vmem [thread:$0]  %s45_s13, 2048, %s47_s14, [#allocation6], %s366_s18, %s366_s18, %s367_s0  }
   0xc   :  { %s61_s20 = sshll.u32 %s368_s19, 4  ;;  %s62_s20 = int_to_ptr.vmem [resolvable:$true] %s61_s20 }
   0xd   :  { %67 = dma.hbm_to_vmem [thread:$0]  %s60_s17, 2048, %s62_s20, [#allocation9], %s366_s18, %s366_s18, %s367_s0  }
   0xe   :  { %355 = dma.done.wait [#allocation3], 128  }
   0xf   :  { %356 = vsyncadd [#allocation3], 4294967168 }
  0x10   :  { %357 = dma.done.wait [#allocation6], 2176  }
  0x11   :  { %358 = vsyncadd [#allocation6], 4294965120 }
  0x12   :  { %359 = dma.done.wait [#allocation9], 2048  }
  0x13   :  { %360 = vsyncadd [#allocation9], 4294965248  ;;  %vm96_vm0 = vcmask 1045504   ;;  %vm92_vm1 = vcmask 48128   ;;  %v87_v0 = vld [vmem:[#allocation5] sm:$0x3f] }
  0x14   :  { %v86_v1 = vld [vmem:[#allocation2] sm:$0xff]  ;;  %v136_v2 = vld [vmem:[#allocation7 + $0x78] sm:$0xff]  ;;  %223 = vmatpush.msk.msra.mxu0 %vm96_vm0, %v87_v0  ;;  %v134_v4 = vld [vmem:[#allocation7 + $0x68] sm:$0xff]  ;;  %s369_s24 = smov [#allocation10]   ;;  %s211_s28 = sshll.u32 %s441_s7, 4  ;;  %s212_s28 = int_to_ptr.hbm [resolvable:$true] %s211_s28 }
  0x15   :  { %141 = vmatpush.msra.mxu1 %v136_v2  ;;  %v135_v3 = vld [vmem:[#allocation7 + $0x70] sm:$0xff]  ;;  %224 = vmatmul.msk.f32.vlgmr.msra.gmra.mxu0 %vm92_vm1, %v86_v1  ;;  %v133_v5 = vld [vmem:[#allocation7 + $0x60] sm:$0xff]  ;;  %v132_v6 = vld [vmem:[#allocation7 + $0x58] sm:$0xff]  ;;  %s209_s25 = sshll.u32 %s369_s24, 4  ;;  %s210_s25 = int_to_ptr.vmem [resolvable:$true] %s209_s25 }
  0x16   :  { %v131_v7 = vld [vmem:[#allocation7 + $0x50] sm:$0xff]  ;;  %v130_v8 = vld [vmem:[#allocation7 + $0x48] sm:$0xff]  ;;  %v129_v9 = vld [vmem:[#allocation7 + $0x40] sm:$0xff] }
  0x17   :  { %142 = vmatpush.msra.mxu1 %v135_v3  ;;  %v128_v10 = vld [vmem:[#allocation7 + $0x38] sm:$0xff]  ;;  %v127_v11 = vld [vmem:[#allocation7 + $0x30] sm:$0xff]  ;;  %v126_v12 = vld [vmem:[#allocation7 + $0x28] sm:$0xff] }
  0x18   :  { %v125_v13 = vld [vmem:[#allocation7 + $0x20] sm:$0xff]  ;;  %v124_v14 = vld [vmem:[#allocation7 + $0x18] sm:$0xff]  ;;  %v123_v15 = vld [vmem:[#allocation7 + $0x10] sm:$0xff] }
  0x19   :  { %143 = vmatpush.msra.mxu1 %v134_v4  ;;  %v122_v16 = vld [vmem:[#allocation7 + $0x8] sm:$0xff]  ;;  %v121_v17 = vld [vmem:[#allocation7] sm:$0xff]  ;;  %v177_v18 = vld [vmem:[#allocation8 + $0x78] sm:$0xff] }
  0x1a   :  { %v176_v19 = vld [vmem:[#allocation8 + $0x70] sm:$0xff]  ;;  %182 = vmatpush.msra.mxu2 %v177_v18  ;;  %v175_v20 = vld [vmem:[#allocation8 + $0x68] sm:$0xff]  ;;  %v174_v21 = vld [vmem:[#allocation8 + $0x60] sm:$0xff] }
  0x1b   :  { %144 = vmatpush.msra.mxu1 %v133_v5  ;;  %v173_v22 = vld [vmem:[#allocation8 + $0x58] sm:$0xff]  ;;  %v172_v23 = vld [vmem:[#allocation8 + $0x50] sm:$0xff]  ;;  %v171_v24 = vld [vmem:[#allocation8 + $0x48] sm:$0xff] }
  0x1c   :  { %183 = vmatpush.msra.mxu2 %v176_v19  ;;  %v170_v25 = vld [vmem:[#allocation8 + $0x40] sm:$0xff]  ;;  %v169_v26 = vld [vmem:[#allocation8 + $0x38] sm:$0xff]  ;;  %v168_v27 = vld [vmem:[#allocation8 + $0x30] sm:$0xff] }
  0x1d   :  { %145 = vmatpush.msra.mxu1 %v132_v6  ;;  %v167_v28 = vld [vmem:[#allocation8 + $0x28] sm:$0xff]  ;;  %v166_v29 = vld [vmem:[#allocation8 + $0x20] sm:$0xff]  ;;  %v165_v30 = vld [vmem:[#allocation8 + $0x18] sm:$0xff] }
  0x1e   :  { %184 = vmatpush.msra.mxu2 %v175_v20  ;;  %v232_v31 = vld [vmem:[%s436_s2] ss:$0 sm:$0xff]  ;;  %v163_v36 = vld [vmem:[#allocation8 + $0x8] sm:$0xff]  ;;  %v162_v37 = vld [vmem:[#allocation8] sm:$0xff] }
  0x1f   :  { %146 = vmatpush.msra.mxu1 %v131_v7  ;;  %v164_v35 = vld [vmem:[#allocation8 + $0x10] sm:$0xff] }
  0x20   :  { %185 = vmatpush.msra.mxu2 %v174_v21  ;;  %v233_v38 = vld [vmem:[%s438_s4] ss:$0 sm:$0xff] }
  0x21   :  { %147 = vmatpush.msra.mxu1 %v130_v8  ;;  %v234_v42 = vld [vmem:[%s440_s6] ss:$0 sm:$0xff] }
  0x22   :  { %186 = vmatpush.msra.mxu2 %v173_v22 }
  0x23   :  { %148 = vmatpush.msra.mxu1 %v129_v9 }
  0x24   :  { %187 = vmatpush.msra.mxu2 %v172_v23 }
  0x25   :  { %149 = vmatpush.msra.mxu1 %v128_v10 }
  0x26   :  { %188 = vmatpush.msra.mxu2 %v171_v24 }
  0x27   :  { %150 = vmatpush.msra.mxu1 %v127_v11 }
  0x28   :  { %189 = vmatpush.msra.mxu2 %v170_v25 }
  0x29   :  { %151 = vmatpush.msra.mxu1 %v126_v12 }
  0x2a   :  { %190 = vmatpush.msra.mxu2 %v169_v26 }
  0x2b   :  { %152 = vmatpush.msra.mxu1 %v125_v13 }
  0x2c   :  { %191 = vmatpush.msra.mxu2 %v168_v27 }
  0x2d   :  { %153 = vmatpush.msra.mxu1 %v124_v14 }
  0x2e   :  { %192 = vmatpush.msra.mxu2 %v167_v28 }
  0x2f   :  { %154 = vmatpush.msra.mxu1 %v123_v15 }
  0x30   :  { %193 = vmatpush.msra.mxu2 %v166_v29 }
  0x31   :  { %155 = vmatpush.msra.mxu1 %v122_v16 }
  0x32   :  { %194 = vmatpush.msra.mxu2 %v165_v30 }
  0x33   :  { %156 = vmatpush.msra.mxu1 %v121_v17 }
  0x34   :  { %195 = vmatpush.msra.mxu2 %v164_v35 }
  0x36   :  { %196 = vmatpush.msra.mxu2 %v163_v36 }
  0x38   :  { %197 = vmatpush.msra.mxu2 %v162_v37 }
  0x92   :  { %v117_v32 = vpop.f32.mrf.mxu0 }
  0x93   :  { %v118_v33 = vadd.f32 %v232_v31, %v117_v32 }
  0x95   :  { %v120_v34 = vmax.f32 %v118_v33, 0.0 }
  0x97   :  { %157 = vmatmul.f32.vlgmr.msra.gmra.mxu1 %v120_v34 }
 0x114   :  { %v158_v39 = vpop.f32.mrf.mxu1 }
 0x115   :  { %v159_v40 = vadd.f32 %v233_v38, %v158_v39 }
 0x117   :  { %v161_v41 = vmax.f32 %v159_v40, 0.0 }
 0x119   :  { %198 = vmatmul.f32.vlgmr.msra.gmra.mxu2 %v161_v41 }
 0x19c   :  { %v199_v43 = vpop.f32.mrf.mxu2 }
 0x19d   :  { %v200_v44 = vadd.f32 %v234_v42, %v199_v43 }
 0x19f   :  { %v202_v45 = vmax.f32 %v200_v44, 0.0 }
 0x1a1   :  { %203 = vst [vmem:[#allocation10] sm:$0xff] %v202_v45 }
 0x1a2   :  { %214 = dma.vmem_to_hbm [thread:$0]  %s210_s25, 128, %s212_s28, [#allocation4]  }
 0x1a3   :  { %361 = dma.done.wait [#allocation4], 128  }
 0x1a4   :  { %362 = vsyncadd [#allocation4], 4294967168 }
 0x1a5   :  { %219 = vsyncpa [#allocation3], 1 }
 0x1a6   :  { %220 = vsyncpa [#allocation6], 1 }
 0x1a7   :  { %221 = vsyncpa [#allocation9], 1 }
 0x1a8   :  { %222 = vsyncpa [#allocation4], 1 }

</bundles_post_ra>
